<compile_context>
chip_gen: v5e
topology: v5e:2x2
jax: 0.10.0
libtpu: 0.0.40
codegen_flags: <defaults>
</compile_context>

<pallas_src>
import functools

import jax
import jax.numpy as jnp
from jax.experimental import pallas as pl
from jax.experimental.pallas import tpu as pltpu


_LANE = 128
_MIN_GRID_STEPS = 4                       # target at least this many grid steps
_DEFAULT_PHYS_VMEM = 64 * 1024 * 1024     # assume smallest (v7x per-core) if unknown


def _round_up(x, m):
    return ((x + m - 1) // m) * m


def _cdiv(a, b):
    return -(-a // b)


def _sublane_multiple(dtype):
    # f32 -> 8 sublanes per tile, bf16 -> 16, int8/fp8 -> 32 (sub-32-bit packing).
    itemsize = jnp.dtype(dtype).itemsize
    return 8 * max(1, 4 // itemsize)


def _padded_block_bytes(block_shape, dtype):
    """VMEM footprint of one kernel-visible block, including (sublane, lane) padding."""
    itemsize = jnp.dtype(dtype).itemsize
    if len(block_shape) == 1:
        lead, sl, ln = (), 1, block_shape[0]
    else:
        lead, sl, ln = block_shape[:-2], block_shape[-2], block_shape[-1]
    n = _round_up(max(sl, 1), _sublane_multiple(dtype)) * _round_up(max(ln, 1), _LANE)
    for d in lead:
        n *= max(d, 1)
    return n * itemsize


def _physical_vmem_bytes():
    try:
        return int(getattr(pltpu.get_tpu_info(), "vmem_capacity_bytes",
                           _DEFAULT_PHYS_VMEM))
    except Exception:
        return _DEFAULT_PHYS_VMEM


def _pair_budget_bytes(phys):
    # Budget for (in + out) padded bytes of ONE block.  Pallas double-buffers
    # both, so the live footprint is ~2x this: <= ~40% of physical VMEM
    # (v7x: ~12.8 MiB/block-pair -> ~25 MiB live; v5e/v6e: ~25 MiB -> ~51 MiB).
    return max(1 << 20, phys // 5)


def _vmem_limit_bytes(pair_bytes, phys):
    needed = 2 * pair_bytes + (2 << 20)       # double-buffered in+out + margin
    return int(min(int(phys * 0.98), max(needed, 32 << 20)))


def _largest_divisor_leq(n, cap):
    cap = max(1, min(n, cap))
    for d in range(cap, 0, -1):
        if n % d == 0:
            return d
    return 1


def _pick_leading_block(extent, per_item_pair_bytes, pair_budget, min_blocks):
    """Largest divisor of `extent` fitting the padded budget with >= min_blocks blocks."""
    cap_budget = max(1, pair_budget // max(1, per_item_pair_bytes))
    cap_steps = max(1, extent // max(1, min_blocks))
    return _largest_divisor_leq(extent, min(cap_budget, cap_steps))


def _lane_dense_factor(h, w, dtype):
    """Re-factor an *untouched* trailing (h, w) pair into a lane-dense (h2, w2).

    Only used when the trailing two axes are not permuted, so any factorization
    of h*w is a free, contiguous reshape outside the kernel.  Picks the
    candidate (w2 a multiple of 128) with the smallest padded tile.
    """
    hw = h * w
    if w % _LANE == 0 or hw % _LANE != 0:
        return h, w
    sub = _sublane_multiple(dtype)
    best, best_pad = (h, w), _round_up(h, sub) * _round_up(w, _LANE)
    w2 = _LANE
    while w2 <= hw:
        if hw % w2 == 0:
            h2 = hw // w2
            pad = _round_up(h2, sub) * w2
            if pad < best_pad:
                best, best_pad = (h2, w2), pad
        w2 *= 2
    return best


# ----------------------------------------------------------------------------- kernels


def _copy_kernel(x_ref, o_ref):
    # The (N, C) swap is done entirely by the BlockSpec index maps (pure DMA
    # re-indexing); the body is a single full-block copy.
    o_ref[...] = x_ref[...]


def _transpose_minor_kernel(x_ref, o_ref):
    # (bl, H, W) -> (bl, W, H): supported minor-dims transpose (XLU vxpose).
    o_ref[...] = jnp.transpose(x_ref[...], (0, 2, 1))


# --------------------------------------------------------------------- pallas builders


def _swap_trailing(x3):
    """(B, H, W) -> (B, W, H) with the flattened leading axis tiled."""
    B, H, W = x3.shape
    dt = x3.dtype
    phys = _physical_vmem_bytes()
    pair = (_padded_block_bytes((1, H, W), dt) +
            _padded_block_bytes((1, W, H), dt))
    bl = _pick_leading_block(B, pair, _pair_budget_bytes(phys),
                             min(B, _MIN_GRID_STEPS))
    return pl.pallas_call(
        _transpose_minor_kernel,
        out_shape=jax.ShapeDtypeStruct((B, W, H), dt),
        grid_spec=pltpu.PrefetchScalarGridSpec(
            num_scalar_prefetch=0,
            grid=(B // bl,),
            in_specs=[pl.BlockSpec((bl, H, W), lambda i: (i, 0, 0))],
            out_specs=pl.BlockSpec((bl, W, H), lambda i: (i, 0, 0)),
        ),
        compiler_params=pltpu.CompilerParams(
            dimension_semantics=("parallel",),
            vmem_limit_bytes=_vmem_limit_bytes(bl * pair, phys),
        ),
        cost_estimate=pl.CostEstimate(
            flops=0, transcendentals=0,
            bytes_accessed=2 * x3.size * jnp.dtype(dt).itemsize),
    )(x3)


def _swap_leading(x4, *, transpose_minor):
    """(N, C, h, w) -> (C, N, h, w)  (or (C, N, w, h) if transpose_minor).

    The (N, C) swap is pure BlockSpec re-indexing: the non-blocked swapped axis
    is a size-1 squeezed block dim iterated by the grid, so the kernel is a
    single full-block copy / minor-dims transpose (no unrolled channel loop).
    """
    N, C, h, w = x4.shape
    dt = x4.dtype
    oh, ow = (w, h) if transpose_minor else (h, w)
    phys = _physical_vmem_bytes()
    pair = (_padded_block_bytes((1, h, w), dt) +
            _padded_block_bytes((1, oh, ow), dt))
    budget = _pair_budget_bytes(phys)
    kernel = _transpose_minor_kernel if transpose_minor else _copy_kernel

    # Block along the larger of the two swapped axes (bigger blocks, fewer grid
    # steps); the other one is iterated one element per grid step (squeezed).
    block_n = N >= C
    blocked, looped = (N, C) if block_n else (C, N)
    min_blocks = min(blocked, _cdiv(_MIN_GRID_STEPS, looped))
    bb = _pick_leading_block(blocked, pair, budget, min_blocks)

    if block_n:
        in_spec = pl.BlockSpec((bb, pl.Squeezed(), h, w),
                               lambda l, j: (j, l, 0, 0))
        out_spec = pl.BlockSpec((pl.Squeezed(), bb, oh, ow),
                                lambda l, j: (l, j, 0, 0))
    else:
        in_spec = pl.BlockSpec((pl.Squeezed(), bb, h, w),
                               lambda l, j: (l, j, 0, 0))
        out_spec = pl.BlockSpec((bb, pl.Squeezed(), oh, ow),
                                lambda l, j: (j, l, 0, 0))

    return pl.pallas_call(
        kernel,
        out_shape=jax.ShapeDtypeStruct((C, N, oh, ow), dt),
        grid_spec=pltpu.PrefetchScalarGridSpec(
            num_scalar_prefetch=0,
            grid=(looped, blocked // bb),
            in_specs=[in_spec],
            out_specs=out_spec,
        ),
        compiler_params=pltpu.CompilerParams(
            dimension_semantics=("parallel", "parallel"),
            vmem_limit_bytes=_vmem_limit_bytes(bb * pair, phys),
        ),
        cost_estimate=pl.CostEstimate(
            flops=0, transcendentals=0,
            bytes_accessed=2 * x4.size * jnp.dtype(dt).itemsize),
    )(x4)


# --------------------------------------------------------------------------- dispatcher


@functools.partial(jax.jit, static_argnames=("perm",))
def permute2d_pallas(x, perm):
    perm = tuple(int(p) for p in perm)
    assert x.ndim == 4, "Permute2d kernel implemented for 4-D (NCHW) inputs"
    assert sorted(perm) == [0, 1, 2, 3], "perm must be a permutation of (0,1,2,3)"
    assert set(perm[:2]) == {0, 1} and set(perm[2:]) == {2, 3}, (
        "only permutations keeping the trailing two axes in trailing positions "
        "are supported by this kernel")

    if perm == (0, 1, 2, 3):
        return x                                      # identity: no data movement

    N, C, H, W = x.shape
    lead_swap = perm[:2] == (1, 0)
    swap_last = perm[2:] == (3, 2)

    if not lead_swap:                                 # (0, 1, 3, 2)
        y = _swap_trailing(x.reshape(N * C, H, W))
        return y.reshape(N, C, W, H)

    if swap_last:                                     # (1, 0, 3, 2)
        return _swap_leading(x, transpose_minor=True)

    # (1, 0, 2, 3): trailing axes untouched -> re-factor them lane-dense first.
    h2, w2 = _lane_dense_factor(H, W, x.dtype)
    y = _swap_leading(x.reshape(N, C, h2, w2), transpose_minor=False)
    return y.reshape(C, N, H, W)


class Permute2d:
    """JAX/Pallas analogue of the PyTorch Permute2d module."""

    def __init__(self, shape):
        self.shape = tuple(int(p) for p in shape)

    def __call__(self, x):
        return permute2d_pallas(x, self.shape)


if __name__ == "__main__":
    key = jax.random.PRNGKey(0)
    # small NCHW input: batch=2, channels=4, H=16, W=16
    x = jax.random.normal(key, (2, 4, 16, 16), dtype=jnp.float32)

    # exercise every supported path: leading+trailing swap, trailing-only swap,
    # leading-only swap (lane-densified), and the identity fast path
    for perm in [(1, 0, 3, 2), (0, 1, 3, 2), (1, 0, 2, 3), (0, 1, 2, 3)]:
        y = jax.block_until_ready(Permute2d(perm)(x))
        y_ref = jnp.transpose(x, perm)
        assert y.shape == y_ref.shape, (perm, y.shape, y_ref.shape)
        assert jnp.array_equal(y, y_ref), f"Pallas permute mismatch for {perm}"

    print("KERNEL_OK")
</pallas_src>

<mosaic_0001>
module attributes {stable_mosaic.version = 11 : i64} {
  func.func @_transpose_minor_kernel(%arg0: i32, %arg1: i32, %arg2: memref<1x2x16x16xf32, #tpu.memory_space<vmem>>, %arg3: memref<2x1x16x16xf32, #tpu.memory_space<vmem>>) attributes {dimension_semantics = [#tpu.dimension_semantics<parallel>, #tpu.dimension_semantics<parallel>], iteration_bounds = array<i64: 2, 2>, scalar_prefetch = 0 : i64, scratch_operands = 0 : i64, tpu.core_type = #tpu.core_type<tc>, window_params = [{transform_indices = @transform_0, window_bounds = array<i64: 1, 2, 16, 16>}, {transform_indices = @transform_1, window_bounds = array<i64: 2, 1, 16, 16>}]} {
    %c0 = arith.constant 0 : index
    %c0_0 = arith.constant 0 : index
    %c0_1 = arith.constant 0 : index
    %c0_2 = arith.constant 0 : index
    %0 = vector.load %arg2[%c0, %c0_0, %c0_1, %c0_2] : memref<1x2x16x16xf32, #tpu.memory_space<vmem>>, vector<1x2x16x16xf32>
    %1 = vector.shape_cast %0 : vector<1x2x16x16xf32> to vector<2x16x16xf32>
    %2 = tpu.transpose %1, [0, 2, 1] : vector<2x16x16xf32> -> vector<2x16x16xf32>
    %c0_3 = arith.constant 0 : index
    %c0_4 = arith.constant 0 : index
    %c0_5 = arith.constant 0 : index
    %c0_6 = arith.constant 0 : index
    %3 = vector.load %arg3[%c0_3, %c0_4, %c0_5, %c0_6] : memref<2x1x16x16xf32, #tpu.memory_space<vmem>>, vector<2x1x16x16xf32>
    %4 = vector.shape_cast %3 : vector<2x1x16x16xf32> to vector<2x16x16xf32>
    %5 = vector.shape_cast %2 : vector<2x16x16xf32> to vector<2x1x16x16xf32>
    tpu.vector_store %arg3[%c0_3, %c0_4, %c0_5, %c0_6], %5 {strides = array<i32>} : memref<2x1x16x16xf32, #tpu.memory_space<vmem>>, vector<2x1x16x16xf32>,
    return
  }
  func.func @transform_0(%arg0: i32, %arg1: i32) -> (i32, i32, i32, i32) {
    %c0_i32 = arith.constant 0 : i32
    %c0_i32_0 = arith.constant 0 : i32
    %c0_i32_1 = arith.constant 0 : i32
    return %arg0, %arg1, %c0_i32, %c0_i32_0 : i32, i32, i32, i32
  }
  func.func @transform_1(%arg0: i32, %arg1: i32) -> (i32, i32, i32, i32) {
    %c0_i32 = arith.constant 0 : i32
    %c0_i32_0 = arith.constant 0 : i32
    %c0_i32_1 = arith.constant 0 : i32
    return %arg1, %arg0, %c0_i32, %c0_i32_0 : i32, i32, i32, i32
  }
}

</mosaic_0001>

<bundles_post_ra>
// kernel: permute2d_pallas.1
= control target key start
LH: loop header
LB: loop body
LE: loop exit
PB: predicated region body
PF: predicated region fallthrough
CT: control target
= control target key end

     0   :  { %6 = vsyncpa [#allocation3], 0  ;;  %s745_s0 = inlined_call_operand.hbm [shape: f32[2,4,16,16], index: 0, kind: input, shape index: {}]   ;;  %s746_s1 = inlined_call_operand.hbm [shape: f32[4,2,16,16], index: 1, kind: output, shape index: {}]  }
   0x1   :  { %8 = vsyncpa [#allocation3 + $0x1], 0 }
   0x2   :  { %9 = vsyncpa [#allocation4], 0 }
   0x3   :  { %11 = vsyncpa [#allocation4 + $0x1], 0  ;;  %s599_s6 = smov 0   ;;  %s601_s7 = smov 0  }
   0x4   :  { %s603_s8 = smov 0   ;;  %s605_s9 = smov 0  }
   0x5   :  { %s607_s10 = smov 0   ;;  %s609_s11 = smov 0  }
   0x6   :  { %s611_s12 = smov 0   ;;  %s613_s13 = smov 0  }
   0x7 LB: > { %s363_s14 = sadd.s32 4294967295, %s578_s13   ;;  %s364_s15 = sadd.s32 4294967294, %s578_s13   ;;  %s578_s13 = sphi %s613_s13, %s17_s13   ;;  %s574_s12 = sphi %s611_s12, %s760_s12   ;;  %s570_s11 = sphi %s609_s11, %s759_s11   ;;  %s566_s10 = sphi %s607_s10, %s758_s10   ;;  %s562_s9 = sphi %s605_s9, %s757_s9   ;;  %s558_s8 = sphi %s603_s8, %s756_s8   ;;  %s554_s7 = sphi %s601_s7, %s755_s7   ;;  %s550_s6 = sphi %s599_s6, %s754_s6  }
   0x8   : > { %s26_s16 = sadd.s32 1, %s570_s11  ;;  %s29_s17 = sadd.s32 1, %s574_s12 }
   0x9   : > { %p27_p0 = scmp.ge.s32.totalorder %s26_s16, 2  ;;  %s38_s18 = sadd.s32 1, %s558_s8 }
   0xa   : > { %p45_p1 = scmp.ne.s32.totalorder %s558_s8, %s554_s7  ;;  %p46_p2 = scmp.eq.s32.totalorder %s578_s13, 0 }
   0xb   : > { %s762_s16 = smov (%p27_p0, %s26_s16), 0  ;;  %s764_s17 = smov (!%p27_p0, %s29_s17), %s574_s12 }
   0xc   : > { %s34_s19 = ssub.s32 %s570_s11, %s762_s16  ;;  %p652_p3 = por %p46_p2, %p45_p1 }
   0xd   : > { %p31_p4 = scmp.ge.s32.totalorder %s764_s17, 2  ;;  %p51_p5 = scmp.ne.s32.totalorder %s554_s7, %s550_s6 }
   0xe   : > { %p52_p6 = scmp.eq.s32.totalorder %s363_s14, 0  ;;  %p77_p7 = scmp.eq.s32.totalorder %s363_s14, 3 }
   0xf   : > { %s766_s17 = smov (%p31_p4, %s764_s17), 0  ;;  %p83_p10 = scmp.eq.s32.totalorder %s364_s15, 3 }
  0x10   : > { %749 = sst [smem:[#allocation10_spill]] %s766_s17  ;;  %p660_p8 = por %p52_p6, %p51_p5 }
  0x11   : > { %p664_p9 = por %p77_p7, %p45_p1  ;;  %s33_s23 = ssub.s32 %s574_s12, %s766_s17 }
  0x12   : > { %s35_s24 = sor.u32 %s34_s19, %s33_s23  ;;  %p670_p12 = por %p83_p10, %p51_p5 }
  0x13   : > { %p36_p11 = scmp.eq.s32.totalorder %s35_s24, 0  ;;  %p402_p13 = scmp.lt.s32.totalorder %s578_s13, 4 }
  0x14   : > { %s103_s26 = sand.u32 1, %s558_s8   ;;  %s382_s29 = sshll.u32 %s570_s11, 2 }
  0x15   : > { %s677_s27 = scalar_select %p36_p11, %s558_s8, %s38_s18  }
  0x16   : > { %s367_s28 = sshll.u32 %s103_s26, 5  ;;  %s370_s30 = sshll.u32 %s574_s12, 3 }
  0x17   : > { %s107_s2 = scalar_lea.vmem [#allocation2], %s367_s28  ;;  %s113_s4 = sadd.s32 %s382_s29, %s370_s30 }
  0x18   : > { %s118_s3 = sshll.u32 %s107_s2, 4  ;;  %s371_s5 = sshll.u32 %s113_s4, 3  ;;  %s119_s3 = int_to_ptr.vmem [resolvable:$true] %s118_s3 }
  0x19   : > { %p395_p0 = pnand %p402_p13, %p652_p3  ;;  %s115_s19 = scalar_lea.hbm %s745_s0, %s371_s5 }
  0x1a   : > { %s116_s23 = sshll.u32 %s115_s19, 4  ;;  %s104_s18 = scalar_lea.sflag [#allocation3], %s103_s26  ;;  %s117_s23 = int_to_ptr.hbm [resolvable:$true] %s116_s23 }
  0x1b   : > { %s580_s24 = smov 128   ;;  %s581_s17 = smov 8  }
  0x1c   : > { %397 = dma.hbm_to_vmem [thread:$0]  (!%p395_p0), %s117_s23, 512, %s119_s3, %s104_s18, %s580_s24, %s580_s24, %s581_s17  }
  0x1d   : > { %p372_p1 = scmp.ge.s32.totalorder %s578_s13, 1  ;;  %p126_p2 = scmp.lt.s32.totalorder %s578_s13, 5 }
  0x1f   : > { %p127_p4 = pnand %p372_p1, %p126_p2 }
  0x20   : > { %s689_s28 = sand.u32 (!%p127_p4), 1, %s554_s7  }
  0x21   : > { %130 = sbr.rel (%p127_p4) target bundleno = 226 (0xe2), region = 24  ;;  %s373_s20 = sshll.u32 (!%p127_p4), %s689_s28, 5 }
  0x22   : > { %s133_s29 = scalar_lea.sflag (!%p127_p4), [#allocation3], %s689_s28  ;;  %s136_s30 = scalar_lea.vmem (!%p127_p4), [#allocation2], %s373_s20 }
  0x26   : > { %541 = dma.done.wait (%p660_p8), %s133_s29, 512  }
  0x27   : > { %543 = vsyncadd (%p660_p8), %s133_s29, 4294966784  ;;  %v160_v0 = vld [vmem:[%s136_s30 + $0x10] sm:$0xff]  ;;  %v158_v1 = vld [vmem:[%s136_s30] sm:$0xff]  ;;  %vm226_vm0 = vcmask 130048   ;;  %s155_s17 = scalar_lea.vmem [#allocation5], %s373_s20  ;;  %s232_s21 = scalar_lea.sflag [#allocation4], %s689_s28 }
  0x28   : > { %194 = vxpose.xlu1.b32.start [1/2] (short) (narrow) %v160_v0, 16  ;;  %162 = vxpose.xlu0.b32.start [1/2] (short) (narrow) %v158_v1, 16  ;;  %v161_v2 = vld [vmem:[%s136_s30 + $0x18] sm:$0xff]  ;;  %v159_v3 = vld [vmem:[%s136_s30 + $0x8] sm:$0xff] }
  0x30   : > { %195 = vxpose.xlu1.b32.end [2/2] (short) (narrow) %v161_v2, 16  ;;  %163 = vxpose.xlu0.b32.end [2/2] (short) (narrow) %v159_v3, 16 }
  0xcc   : > { %v210_v4 = vpop.trf.xlu1  ;;  %v178_v5 = vpop.trf.xlu0 }
  0xcd   : > { %229 = vst.msk [vmem:[%s155_s17 + $0x10] sm:$0xff] %vm226_vm0, %v210_v4 }
  0xce   : > { %227 = vst.msk [vmem:[%s155_s17] sm:$0xff] %vm226_vm0, %v178_v5 }
  0xd4   : > { %v211_v6 = vpop.trf.xlu1  ;;  %v179_v7 = vpop.trf.xlu0 }
  0xd5   : > { %230 = vst.msk [vmem:[%s155_s17 + $0x18] sm:$0xff] %vm226_vm0, %v211_v6 }
  0xd6   : > { %228 = vst.msk [vmem:[%s155_s17 + $0x8] sm:$0xff] %vm226_vm0, %v179_v7 }
  0xd7   : > { %s377_s26 = sshll.u32 %s566_s10, 1  ;;  %s383_s2 = sshll.u32 %s562_s9, 3 }
  0xd8   : > { %s244_s3 = sadd.s32 %s383_s2, %s377_s26  ;;  %s257_s4 = sshll.u32 %s155_s17, 4  ;;  %s258_s4 = int_to_ptr.vmem [resolvable:$true] %s257_s4 }
  0xd9   : > { %s379_s5 = sshll.u32 %s244_s3, 3  ;;  %s582_s18 = smov 256  }
  0xda   : > { %s246_s19 = scalar_lea.hbm %s746_s1, %s379_s5  ;;  %386 = sst [smem:[#allocation7]] (%p664_p9), %s582_s18 }
  0xdb   : > { %s259_s23 = sshll.u32 %s246_s19, 4  ;;  %s583_s24 = smov 512   ;;  %s260_s23 = int_to_ptr.hbm [resolvable:$true] %s259_s23 }
  0xdc   : > { %387 = sst [smem:[#allocation7 + $0x1]] (%p664_p9), %s583_s24  ;;  %s584_s9 = smov 2  }
  0xdd   : > { %388 = sst [smem:[#allocation7 + $0x2]] (%p664_p9), %s584_s9  ;;  %s585_s10 = smov 128  }
  0xde   : > { %389 = sst [smem:[#allocation7 + $0x3]] (%p664_p9), %s585_s10  ;;  %s586_s28 = smov 8  }
  0xdf   : > { %390 = sst [smem:[#allocation7 + $0x4]] (%p664_p9), %s585_s10  ;;  %s587_s20 = smov [#allocation6]  }
  0xe0   : > { %391 = sst [smem:[#allocation7 + $0x5]] (%p664_p9), %s586_s28  ;;  %s588_s29 = smov 0  }
  0xe1   : > { %392 = dma.general (%p664_p9), %s258_s4, 512, %s260_s23, %s232_s21, %s587_s20, [#allocation7], %s588_s29, 0  }
  0xe2 PF: > { %p403_p3 = scmp.ge.s32.totalorder %s578_s13, 2  ;;  %s287_s30 = sand.u32 1, %s550_s6  }
  0xe3   : > { %s288_s17 = scalar_lea.sflag [#allocation4], %s287_s30 }
  0xe4   : > { %p399_p5 = pnand %p403_p3, %p670_p12 }
  0xe6   : > { %p400_p6 = pneg %p399_p5 }
  0xe8   : > { %545 = dma.done.wait (%p400_p6), %s288_s17, 512  }
  0xe9   : > { %547 = vsyncadd (%p400_p6), %s288_s17, 4294966784  ;;  %s17_s13 = sadd.s32 1, %s578_s13   ;;  %s753_s22 = sld [smem:[#allocation10_spill]] }
  0xea   : > { %p14_p7 = scmp.ge.s32.totalorder %s17_s13, 6   ;;  %s754_s6 = smov %s554_s7 }
  0xeb   : > { %s755_s7 = smov %s558_s8  ;;  %s756_s8 = smov %s677_s27 }
  0xec   : > { %s757_s9 = smov %s570_s11  ;;  %s758_s10 = smov %s574_s12 }
  0xed   : > { %s759_s11 = smov %s762_s16  ;;  %16 = sbr.rel (!%p14_p7) target bundleno = 7 (0x7), region = 74 }
  0xef   : > { %s760_s12 = smov %s753_s22 }
  0xf2   :  { %294 = vsyncpa [#allocation3], 1 }
  0xf3   :  { %296 = vsyncpa [#allocation3 + $0x1], 1 }
  0xf4   :  { %297 = vsyncpa [#allocation4], 1 }
  0xf5   :  { %299 = vsyncpa [#allocation4 + $0x1], 1 }

</bundles_post_ra>
